<compile_context>
chip_gen: v7x
topology: tpu7x:2x2x1
jax: 0.10.0
libtpu: 0.0.40
codegen_flags: <defaults>
</compile_context>

<pallas_src>
import jax
import jax.numpy as jnp
from jax.experimental import pallas as pl
from jax.experimental.pallas import tpu as pltpu

LANE = 128
SUBLANE = 8


def _round_up(x, m):
    return ((x + m - 1) // m) * m


def policy_net_kernel(x_ref,
                      w0_ref, b0_ref,
                      w1_ref, b1_ref,
                      w2_ref, b2_ref,
                      w3_ref, b3_ref,
                      out_ref):
    """4-layer MLP on one batch tile: three ReLU hidden layers + linear head.

    Matmuls run on the MXU in bf16 with f32 accumulation; the bias-add / ReLU
    epilogue stays in f32 on the VPU.  Weights/biases are VMEM-resident across
    the whole grid, only the x / out tiles stream through HBM.
    """
    x = x_ref[...].astype(jnp.bfloat16)

    h = jnp.dot(x, w0_ref[...], preferred_element_type=jnp.float32) + b0_ref[...]
    h = jnp.maximum(h, 0.0)

    h = jnp.dot(h.astype(jnp.bfloat16), w1_ref[...],
                preferred_element_type=jnp.float32) + b1_ref[...]
    h = jnp.maximum(h, 0.0)

    h = jnp.dot(h.astype(jnp.bfloat16), w2_ref[...],
                preferred_element_type=jnp.float32) + b2_ref[...]
    h = jnp.maximum(h, 0.0)

    out = jnp.dot(h.astype(jnp.bfloat16), w3_ref[...],
                  preferred_element_type=jnp.float32) + b3_ref[...]
    out_ref[...] = out.astype(out_ref.dtype)


def policy_net_forward(x, params, *, batch_tile=1024):
    """params: list of (W, b) with W already (in, out), b (1, out), all f32."""
    (w0, b0), (w1, b1), (w2, b2), (w3, b3) = params
    batch, d_states = x.shape
    d_out = w3.shape[1]

    # Lane-dense head: zero-pad final weight/bias to a multiple of 128 output
    # columns so the output store is a full-width (unmasked) vector store.
    d_out_p = _round_up(max(d_out, LANE), LANE)
    if d_out_p != d_out:
        w3 = jnp.pad(w3, ((0, 0), (0, d_out_p - d_out)))
        b3 = jnp.pad(b3, ((0, 0), (0, d_out_p - d_out)))

    # Weights bf16 (MXU-native, less HBM/VMEM traffic); biases stay f32 so the
    # elementwise epilogue is f32 on every TPU generation.
    w0, w1, w2, w3 = (w.astype(jnp.bfloat16) for w in (w0, w1, w2, w3))
    b0, b1, b2, b3 = (b.astype(jnp.float32) for b in (b0, b1, b2, b3))

    # Batch tiling: large tiles amortize per-step overhead; tiny batches still
    # collapse to a single grid point.  Pad batch rows to a tile multiple.
    tb = min(batch_tile, _round_up(batch, SUBLANE))
    tb = _round_up(tb, SUBLANE)
    batch_p = _round_up(batch, tb)
    if batch_p != batch:
        x = jnp.pad(x, ((0, batch_p - batch), (0, 0)))
    grid = (batch_p // tb,)

    def resident(shape):  # same block for every grid step -> stays in VMEM
        return pl.BlockSpec(shape, lambda i: (0,) * len(shape))

    out_p = pl.pallas_call(
        policy_net_kernel,
        out_shape=jax.ShapeDtypeStruct((batch_p, d_out_p), jnp.float32),
        grid=grid,
        in_specs=[
            pl.BlockSpec((tb, d_states), lambda i: (i, 0)),  # x: batch-tiled
            resident(w0.shape), resident(b0.shape),
            resident(w1.shape), resident(b1.shape),
            resident(w2.shape), resident(b2.shape),
            resident(w3.shape), resident(b3.shape),
        ],
        out_specs=pl.BlockSpec((tb, d_out_p), lambda i: (i, 0)),
        compiler_params=pltpu.CompilerParams(
            # batch axis is independent -> shard across TensorCores on v7x;
            # harmless no-op on v5e/v6e.
            dimension_semantics=("parallel",),
        ),
    )(x, w0, b0, w1, b1, w2, b2, w3, b3)

    # Strip batch padding and the lane-padding of the head.
    return out_p[:batch, :d_out]


def init_policy_net_params(key, d_states, d_actions, n_hidden):
    """Deterministic synthetic init mirroring nn.Linear shapes.

    PyTorch Linear(i, o): weight (o, i), bias (o,).  We build (i, o) / (1, o).
    """
    dims = [(d_states, n_hidden),
            (n_hidden, n_hidden),
            (n_hidden, n_hidden),
            (n_hidden, d_actions * 2)]
    params = []
    for (d_in, d_out) in dims:
        key, kw, kb = jax.random.split(key, 3)
        bound = 1.0 / jnp.sqrt(d_in)  # matches nn.Linear U(-1/sqrt(in), 1/sqrt(in))
        w = jax.random.uniform(kw, (d_in, d_out), jnp.float32, -bound, bound)
        b = jax.random.uniform(kb, (1, d_out), jnp.float32, -bound, bound)
        params.append((w, b))
    return params


def policy_net_reference(x, params):
    """Plain-JAX f32 reference for correctness checking."""
    (w0, b0), (w1, b1), (w2, b2), (w3, b3) = params
    h = jnp.maximum(x @ w0 + b0, 0.0)
    h = jnp.maximum(h @ w1 + b1, 0.0)
    h = jnp.maximum(h @ w2 + b2, 0.0)
    return h @ w3 + b3


if __name__ == "__main__":
    d_states, d_actions, n_hidden = 16, 4, 32

    key = jax.random.PRNGKey(0)
    key, kx1, kx2 = jax.random.split(key, 3)
    params = init_policy_net_params(key, d_states, d_actions, n_hidden)

    # Case 1: tiny batch (single grid point), matches original test shapes.
    batch = 8
    x = jax.random.normal(kx1, (batch, d_states), jnp.float32)
    out = jax.block_until_ready(policy_net_forward(x, params))
    ref = policy_net_reference(x, params)
    assert out.shape == (batch, d_actions * 2), out.shape
    assert jnp.allclose(out, ref, atol=5e-2, rtol=5e-2), "mismatch vs reference (small)"

    # Case 2: non-multiple batch with a multi-step grid (exercises padding,
    # batch tiling, and the resident-weight pipeline).
    batch2 = 240
    x2 = jax.random.normal(kx2, (batch2, d_states), jnp.float32)
    out2 = jax.block_until_ready(policy_net_forward(x2, params, batch_tile=64))
    ref2 = policy_net_reference(x2, params)
    assert out2.shape == (batch2, d_actions * 2), out2.shape
    assert jnp.allclose(out2, ref2, atol=5e-2, rtol=5e-2), "mismatch vs reference (tiled)"

    print("KERNEL_OK")
</pallas_src>

<mosaic_0001>
module attributes {stable_mosaic.version = 11 : i64} {
  func.func @policy_net_kernel(%arg0: i32, %arg1: memref<8x16xf32, #tpu.memory_space<vmem>>, %arg2: memref<16x32xbf16, #tpu.memory_space<vmem>>, %arg3: memref<1x32xf32, #tpu.memory_space<vmem>>, %arg4: memref<32x32xbf16, #tpu.memory_space<vmem>>, %arg5: memref<1x32xf32, #tpu.memory_space<vmem>>, %arg6: memref<32x32xbf16, #tpu.memory_space<vmem>>, %arg7: memref<1x32xf32, #tpu.memory_space<vmem>>, %arg8: memref<32x128xbf16, #tpu.memory_space<vmem>>, %arg9: memref<1x128xf32, #tpu.memory_space<vmem>>, %arg10: memref<8x128xf32, #tpu.memory_space<vmem>>) attributes {dimension_semantics = [#tpu.dimension_semantics<parallel>], iteration_bounds = array<i64: 1>, scalar_prefetch = 0 : i64, scratch_operands = 0 : i64, tpu.core_type = #tpu.core_type<tc>, window_params = [{transform_indices = @transform_0, window_bounds = array<i64: 8, 16>}, {pipeline_mode = #tpu.pipeline_mode<synchronous>, transform_indices = @transform_1, window_bounds = array<i64: 16, 32>}, {pipeline_mode = #tpu.pipeline_mode<synchronous>, transform_indices = @transform_2, window_bounds = array<i64: 1, 32>}, {pipeline_mode = #tpu.pipeline_mode<synchronous>, transform_indices = @transform_3, window_bounds = array<i64: 32, 32>}, {pipeline_mode = #tpu.pipeline_mode<synchronous>, transform_indices = @transform_4, window_bounds = array<i64: 1, 32>}, {pipeline_mode = #tpu.pipeline_mode<synchronous>, transform_indices = @transform_5, window_bounds = array<i64: 32, 32>}, {pipeline_mode = #tpu.pipeline_mode<synchronous>, transform_indices = @transform_6, window_bounds = array<i64: 1, 32>}, {pipeline_mode = #tpu.pipeline_mode<synchronous>, transform_indices = @transform_7, window_bounds = array<i64: 32, 128>}, {pipeline_mode = #tpu.pipeline_mode<synchronous>, transform_indices = @transform_8, window_bounds = array<i64: 1, 128>}, {transform_indices = @transform_9, window_bounds = array<i64: 8, 128>}]} {
    %c0 = arith.constant 0 : index
    %c0_0 = arith.constant 0 : index
    %0 = vector.load %arg1[%c0, %c0_0] : memref<8x16xf32, #tpu.memory_space<vmem>>, vector<8x16xf32>
    %1 = arith.truncf %0 : vector<8x16xf32> to vector<8x16xbf16>
    %c0_1 = arith.constant 0 : index
    %c0_2 = arith.constant 0 : index
    %2 = vector.load %arg2[%c0_1, %c0_2] : memref<16x32xbf16, #tpu.memory_space<vmem>>, vector<16x32xbf16>
    %cst = arith.constant dense<0.000000e+00> : vector<8x32xf32>
    %3 = tpu.matmul %1, %2, %cst {dimension_numbers = #tpu.dot_dimension_numbers<[1], [0], [0], [1], [0, 0, 1, 1], [], []>} : vector<8x16xbf16>, vector<16x32xbf16>, vector<8x32xf32> -> vector<8x32xf32>
    %c0_3 = arith.constant 0 : index
    %c0_4 = arith.constant 0 : index
    %4 = vector.load %arg3[%c0_3, %c0_4] : memref<1x32xf32, #tpu.memory_space<vmem>>, vector<1x32xf32>
    %5 = vector.broadcast %4 : vector<1x32xf32> to vector<8x32xf32>
    %6 = arith.addf %3, %5 : vector<8x32xf32>
    %cst_5 = arith.constant 0.000000e+00 : f32
    %7 = vector.broadcast %cst_5 : f32 to vector<8x32xf32>
    %8 = arith.maximumf %6, %7 : vector<8x32xf32>
    %9 = arith.truncf %8 : vector<8x32xf32> to vector<8x32xbf16>
    %c0_6 = arith.constant 0 : index
    %c0_7 = arith.constant 0 : index
    %10 = vector.load %arg4[%c0_6, %c0_7] : memref<32x32xbf16, #tpu.memory_space<vmem>>, vector<32x32xbf16>
    %cst_8 = arith.constant dense<0.000000e+00> : vector<8x32xf32>
    %11 = tpu.matmul %9, %10, %cst_8 {dimension_numbers = #tpu.dot_dimension_numbers<[1], [0], [0], [1], [0, 0, 1, 1], [], []>} : vector<8x32xbf16>, vector<32x32xbf16>, vector<8x32xf32> -> vector<8x32xf32>
    %c0_9 = arith.constant 0 : index
    %c0_10 = arith.constant 0 : index
    %12 = vector.load %arg5[%c0_9, %c0_10] : memref<1x32xf32, #tpu.memory_space<vmem>>, vector<1x32xf32>
    %13 = vector.broadcast %12 : vector<1x32xf32> to vector<8x32xf32>
    %14 = arith.addf %11, %13 : vector<8x32xf32>
    %cst_11 = arith.constant 0.000000e+00 : f32
    %15 = vector.broadcast %cst_11 : f32 to vector<8x32xf32>
    %16 = arith.maximumf %14, %15 : vector<8x32xf32>
    %17 = arith.truncf %16 : vector<8x32xf32> to vector<8x32xbf16>
    %c0_12 = arith.constant 0 : index
    %c0_13 = arith.constant 0 : index
    %18 = vector.load %arg6[%c0_12, %c0_13] : memref<32x32xbf16, #tpu.memory_space<vmem>>, vector<32x32xbf16>
    %cst_14 = arith.constant dense<0.000000e+00> : vector<8x32xf32>
    %19 = tpu.matmul %17, %18, %cst_14 {dimension_numbers = #tpu.dot_dimension_numbers<[1], [0], [0], [1], [0, 0, 1, 1], [], []>} : vector<8x32xbf16>, vector<32x32xbf16>, vector<8x32xf32> -> vector<8x32xf32>
    %c0_15 = arith.constant 0 : index
    %c0_16 = arith.constant 0 : index
    %20 = vector.load %arg7[%c0_15, %c0_16] : memref<1x32xf32, #tpu.memory_space<vmem>>, vector<1x32xf32>
    %21 = vector.broadcast %20 : vector<1x32xf32> to vector<8x32xf32>
    %22 = arith.addf %19, %21 : vector<8x32xf32>
    %cst_17 = arith.constant 0.000000e+00 : f32
    %23 = vector.broadcast %cst_17 : f32 to vector<8x32xf32>
    %24 = arith.maximumf %22, %23 : vector<8x32xf32>
    %25 = arith.truncf %24 : vector<8x32xf32> to vector<8x32xbf16>
    %c0_18 = arith.constant 0 : index
    %c0_19 = arith.constant 0 : index
    %26 = vector.load %arg8[%c0_18, %c0_19] : memref<32x128xbf16, #tpu.memory_space<vmem>>, vector<32x128xbf16>
    %cst_20 = arith.constant dense<0.000000e+00> : vector<8x128xf32>
    %27 = tpu.matmul %25, %26, %cst_20 {dimension_numbers = #tpu.dot_dimension_numbers<[1], [0], [0], [1], [0, 0, 1, 1], [], []>} : vector<8x32xbf16>, vector<32x128xbf16>, vector<8x128xf32> -> vector<8x128xf32>
    %c0_21 = arith.constant 0 : index
    %c0_22 = arith.constant 0 : index
    %28 = vector.load %arg9[%c0_21, %c0_22] : memref<1x128xf32, #tpu.memory_space<vmem>>, vector<1x128xf32>
    %29 = vector.broadcast %28 : vector<1x128xf32> to vector<8x128xf32>
    %30 = arith.addf %27, %29 : vector<8x128xf32>
    %c0_23 = arith.constant 0 : index
    %c0_24 = arith.constant 0 : index
    %31 = vector.load %arg10[%c0_23, %c0_24] : memref<8x128xf32, #tpu.memory_space<vmem>>, vector<8x128xf32>
    tpu.vector_store %arg10[%c0_23, %c0_24], %30 {strides = array<i32>} : memref<8x128xf32, #tpu.memory_space<vmem>>, vector<8x128xf32>,
    return
  }
  func.func @transform_0(%arg0: i32) -> (i32, i32) {
    %c0_i32 = arith.constant 0 : i32
    %c0_i32_0 = arith.constant 0 : i32
    return %arg0, %c0_i32 : i32, i32
  }
  func.func @transform_1(%arg0: i32) -> (i32, i32) {
    %c0_i32 = arith.constant 0 : i32
    %c0_i32_0 = arith.constant 0 : i32
    %c0_i32_1 = arith.constant 0 : i32
    return %c0_i32, %c0_i32_0 : i32, i32
  }
  func.func @transform_2(%arg0: i32) -> (i32, i32) {
    %c0_i32 = arith.constant 0 : i32
    %c0_i32_0 = arith.constant 0 : i32
    %c0_i32_1 = arith.constant 0 : i32
    return %c0_i32, %c0_i32_0 : i32, i32
  }
  func.func @transform_3(%arg0: i32) -> (i32, i32) {
    %c0_i32 = arith.constant 0 : i32
    %c0_i32_0 = arith.constant 0 : i32
    %c0_i32_1 = arith.constant 0 : i32
    return %c0_i32, %c0_i32_0 : i32, i32
  }
  func.func @transform_4(%arg0: i32) -> (i32, i32) {
    %c0_i32 = arith.constant 0 : i32
    %c0_i32_0 = arith.constant 0 : i32
    %c0_i32_1 = arith.constant 0 : i32
    return %c0_i32, %c0_i32_0 : i32, i32
  }
  func.func @transform_5(%arg0: i32) -> (i32, i32) {
    %c0_i32 = arith.constant 0 : i32
    %c0_i32_0 = arith.constant 0 : i32
    %c0_i32_1 = arith.constant 0 : i32
    return %c0_i32, %c0_i32_0 : i32, i32
  }
  func.func @transform_6(%arg0: i32) -> (i32, i32) {
    %c0_i32 = arith.constant 0 : i32
    %c0_i32_0 = arith.constant 0 : i32
    %c0_i32_1 = arith.constant 0 : i32
    return %c0_i32, %c0_i32_0 : i32, i32
  }
  func.func @transform_7(%arg0: i32) -> (i32, i32) {
    %c0_i32 = arith.constant 0 : i32
    %c0_i32_0 = arith.constant 0 : i32
    %c0_i32_1 = arith.constant 0 : i32
    return %c0_i32, %c0_i32_0 : i32, i32
  }
  func.func @transform_8(%arg0: i32) -> (i32, i32) {
    %c0_i32 = arith.constant 0 : i32
    %c0_i32_0 = arith.constant 0 : i32
    %c0_i32_1 = arith.constant 0 : i32
    return %c0_i32, %c0_i32_0 : i32, i32
  }
  func.func @transform_9(%arg0: i32) -> (i32, i32) {
    %c0_i32 = arith.constant 0 : i32
    %c0_i32_0 = arith.constant 0 : i32
    return %arg0, %c0_i32 : i32, i32
  }
}

</mosaic_0001>

<bundles_post_ra>
// kernel: tpu_custom_call.1
= control target key start
LH: loop header
LB: loop body
LE: loop exit
PB: predicated region body
PF: predicated region fallthrough
CT: control target
= control target key end

     0   :  { %14 = vsyncpa [#allocation3], 0  ;;  %s714_s0 = inlined_call_operand.hbm [shape: f32[8,16], index: 0, kind: input, shape index: {}]   ;;  %s715_s1 = inlined_call_operand.hbm [shape: bf16[16,32], index: 1, kind: input, shape index: {}]   ;;  %s716_s2 = inlined_call_operand.vmem [shape: f32[1,32], index: 2, kind: input, shape index: {}]   ;;  %s717_s3 = inlined_call_operand.hbm [shape: bf16[32,32], index: 3, kind: input, shape index: {}]   ;;  %s718_s4 = inlined_call_operand.vmem [shape: f32[1,32], index: 4, kind: input, shape index: {}]   ;;  %s719_s5 = inlined_call_operand.vmem [shape: bf16[32,32], index: 5, kind: input, shape index: {}]   ;;  %s720_s6 = inlined_call_operand.vmem [shape: f32[1,32], index: 6, kind: input, shape index: {}]   ;;  %s721_s7 = inlined_call_operand.hbm [shape: bf16[32,128], index: 7, kind: input, shape index: {}]   ;;  %s722_s8 = inlined_call_operand.vmem [shape: f32[1,128], index: 8, kind: input, shape index: {}]   ;;  %s723_s9 = inlined_call_operand.hbm [shape: f32[8,128], index: 9, kind: output, shape index: {}]  }
   0x1   :  { %15 = vsyncpa [#allocation6], 0 }
   0x2   :  { %16 = vsyncpa [#allocation9], 0 }
   0x3   :  { %17 = vsyncpa [#allocation4], 0  ;;  %s561_s30 = smov [#allocation5]   ;;  %s443_s13 = scalar_lea.hbm %s715_s1, 128 }
   0x4   :  { %s33_s10 = sshll.u32 %s561_s30, 4  ;;  %p444_p0 = scmp.ne.s32.totalorder %s715_s1, %s443_s13  ;;  %s34_s10 = int_to_ptr.vmem [resolvable:$true] %s33_s10 }
   0x5   :  { %p447_p1 = scmp.lt.u32.totalorder %s443_s13, %s715_s1 }
   0x7   :  { %p449_p2 = pnand %p447_p1, %p444_p0 }
   0x9   :  { %452 = shalt.err (!%p449_p2)
}
   0xa   :  { %s453_s18 = scalar_lea.vmem %s34_s10, 128  ;;  %p458_p4 = scmp.lt.s32.totalorder %s34_s10, %s34_s10 }
   0xb   :  { %p454_p3 = scmp.ne.s32.totalorder %s34_s10, %s453_s18  ;;  %p459_p5 = scmp.lt.s32.totalorder %s453_s18, %s453_s18 }
   0xd   :  { %p460_p6 = por %p459_p5, %p458_p4 }
   0xf   :  { %p461_p7 = pnand %p460_p6, %p454_p3 }
  0x11   :  { %464 = shalt.err (!%p461_p7)
}
  0x12   :  { %s562_s19 = smov 64   ;;  %s563_s20 = smov 4  }
  0x13   :  { %39 = dma.hbm_to_vmem [thread:$0]  %s715_s1, 128, %s34_s10, [#allocation6], %s562_s19, %s562_s19, %s563_s20  }
  0x14   :  { %s564_s23 = smov [#allocation2]   ;;  %s565_s25 = smov [#allocation7]  }
  0x15   :  { %s24_s24 = sshll.u32 %s564_s23, 4  ;;  %s47_s26 = sshll.u32 %s565_s25, 4  ;;  %s25_s24 = int_to_ptr.vmem [resolvable:$true] %s24_s24  ;;  %s48_s26 = int_to_ptr.vmem [resolvable:$true] %s47_s26 }
  0x16   :  { %s465_s29 = scalar_lea.hbm %s714_s0, 128 }
  0x17   :  { %p466_p8 = scmp.ne.s32.totalorder %s714_s0, %s465_s29  ;;  %p469_p9 = scmp.lt.u32.totalorder %s465_s29, %s714_s0 }
  0x19   :  { %p471_p10 = pnand %p469_p9, %p466_p8 }
  0x1b   :  { %474 = shalt.err (!%p471_p10)
}
  0x1c   :  { %s475_s1 = scalar_lea.vmem %s25_s24, 128  ;;  %p480_p12 = scmp.lt.s32.totalorder %s25_s24, %s25_s24 }
  0x1d   :  { %p476_p11 = scmp.ne.s32.totalorder %s25_s24, %s475_s1  ;;  %p481_p13 = scmp.lt.s32.totalorder %s475_s1, %s475_s1 }
  0x1f   :  { %p482_p0 = por %p481_p13, %p480_p12 }
  0x21   :  { %p483_p1 = pnand %p482_p0, %p476_p11 }
  0x23   :  { %486 = shalt.err (!%p483_p1)
}
  0x24   :  { %27 = dma.hbm_to_vmem [thread:$0]  %s714_s0, 128, %s25_s24, [#allocation3]  }
  0x25   :  { %s487_s17 = scalar_lea.hbm %s717_s3, 256 }
  0x26   :  { %p488_p2 = scmp.ne.s32.totalorder %s717_s3, %s487_s17  ;;  %p491_p3 = scmp.lt.u32.totalorder %s487_s17, %s717_s3 }
  0x28   :  { %p493_p4 = pnand %p491_p3, %p488_p2 }
  0x2a   :  { %496 = shalt.err (!%p493_p4)
}
  0x2b   :  { %s497_s25 = scalar_lea.vmem %s48_s26, 256  ;;  %p502_p6 = scmp.lt.s32.totalorder %s48_s26, %s48_s26 }
  0x2c   :  { %p498_p5 = scmp.ne.s32.totalorder %s48_s26, %s497_s25  ;;  %p503_p7 = scmp.lt.s32.totalorder %s497_s25, %s497_s25 }
  0x2e   :  { %p504_p8 = por %p503_p7, %p502_p6 }
  0x30   :  { %p505_p9 = pnand %p504_p8, %p498_p5 }
  0x32   :  { %508 = shalt.err (!%p505_p9)
}
  0x33   :  { %53 = dma.hbm_to_vmem [thread:$0]  %s717_s3, 256, %s48_s26, [#allocation6], %s562_s19, %s562_s19, %s563_s20  }
  0x34   :  { %s566_s27 = smov [#allocation8]   ;;  %s509_s11 = scalar_lea.hbm %s721_s7, 256 }
  0x35   :  { %s65_s28 = sshll.u32 %s566_s27, 4  ;;  %p510_p10 = scmp.ne.s32.totalorder %s721_s7, %s509_s11  ;;  %s66_s28 = int_to_ptr.vmem [resolvable:$true] %s65_s28 }
  0x36   :  { %p513_p11 = scmp.lt.u32.totalorder %s509_s11, %s721_s7 }
  0x38   :  { %p515_p12 = pnand %p513_p11, %p510_p10 }
  0x3a   :  { %518 = shalt.err (!%p515_p12)
}
  0x3b   :  { %s519_s14 = scalar_lea.vmem %s66_s28, 256  ;;  %p524_p0 = scmp.lt.s32.totalorder %s66_s28, %s66_s28 }
  0x3c   :  { %p520_p13 = scmp.ne.s32.totalorder %s66_s28, %s519_s14  ;;  %p525_p1 = scmp.lt.s32.totalorder %s519_s14, %s519_s14 }
  0x3e   :  { %p526_p2 = por %p525_p1, %p524_p0 }
  0x40   :  { %p527_p3 = pnand %p526_p2, %p520_p13 }
  0x42   :  { %530 = shalt.err (!%p527_p3)
}
  0x43   :  { %71 = dma.hbm_to_vmem [thread:$0]  %s721_s7, 256, %s66_s28, [#allocation9], %s562_s19, %s562_s19, %s563_s20  }
  0x44   :  { %553 = dma.done.wait [#allocation3], 128  }
  0x45   :  { %554 = vsyncadd [#allocation3], 4294967168 }
  0x46   :  { %555 = dma.done.wait [#allocation6], 384  }
  0x47   :  { %556 = vsyncadd [#allocation6], 4294966912 }
  0x48   :  { %557 = dma.done.wait [#allocation9], 256  }
  0x49   :  { %558 = vsyncadd [#allocation9], 4294967040  ;;  %v567_v0 = vmov 0.0   ;;  %vm568_vm0 = vmmov 0   ;;  %v436_v1 = vld [vmem:[#allocation5] sm:$0xff]   ;;  %v87_v2 = vld [vmem:[#allocation2] sm:$0xff] }
  0x4a   :  { %397 = vmatprep.subr.bf16.mxu0 %v567_v0  ;;  %399 = vmatprep.mubr.msk.bf16.mxu0 %vm568_vm0, %v567_v0  ;;  %vm104_vm1 = vcmask 130048   ;;  %v88_v3 = vpack.c.bf16 %v87_v2, %v87_v2  ;;  %v437_v4 = vld [vmem:[#allocation7] sm:$0xff]   ;;  %v438_v5 = vld [vmem:[#allocation7 + $0x8] sm:$0xff]   ;;  %vm173_vm2 = vcmask 261120   ;;  %v441_v16 = vld [vmem:[#allocation8] sm:$0xff]   ;;  %s569_s23 = smov [#allocation10]  }
  0x4b   :  { %403 = vmatprep.subr.bf16.mxu1 %v567_v0  ;;  %407 = vmatprep.mubr.msk.bf16.mxu1 %vm568_vm0, %v567_v0  ;;  %v439_v6 = vld [vmem:[%s719_s5] sm:$0xff]   ;;  %v440_v15 = vld [vmem:[%s719_s5 + $0x8] sm:$0xff]   ;;  %v442_v25 = vld [vmem:[#allocation8 + $0x8] sm:$0xff]   ;;  %s360_s25 = sshll.u32 %s569_s23, 4  ;;  %s361_s25 = int_to_ptr.vmem [resolvable:$true] %s360_s25 }
  0x4c   :  { %398 = vmatpush3.bf16.msra.mxu0 %v436_v1  ;;  %404 = vmatpush3.bf16.msra.mxu1 %v437_v4  ;;  %v371_v7 = vld [vmem:[%s716_s2] ss:$0 sm:$0xff]  ;;  %p536_p5 = scmp.lt.s32.totalorder %s361_s25, %s361_s25 }
  0x4d   :  { %411 = vmatprep.subr.bf16.mxu0 %v567_v0  ;;  %405 = vmatprep.subr.bf16.mxu1 %v567_v0  ;;  %v374_v17 = vld [vmem:[%s718_s4] ss:$0 sm:$0xff] }
  0x4e   :  { %v378_v26 = vld [vmem:[%s720_s6] ss:$0 sm:$0xff]  ;;  %s531_s6 = scalar_lea.vmem %s361_s25, 128 }
  0x4f   :  { %400 = vmatmul.mubr.msk.bf16.vlgmr.msra.gmra.mrb[0].mxu0 %vm104_vm1, %v88_v3  ;;  %v382_v34 = vld [vmem:[%s722_s8] ss:$0 sm:$0xff]  ;;  %p532_p4 = scmp.ne.s32.totalorder %s361_s25, %s531_s6  ;;  %p537_p6 = scmp.lt.s32.totalorder %s531_s6, %s531_s6 }
  0x50   :  { %415 = vmatprep.mubr.msk.bf16.mxu0 %vm568_vm0, %v567_v0  ;;  %406 = vmatpush3.bf16.msra.mxu1 %v438_v5 }
  0x51   :  { %419 = vmatprep.subr.bf16.mxu1 %v567_v0  ;;  %412 = vmatpush3.bf16.msra.mxu0 %v439_v6  ;;  %p538_p7 = por %p537_p6, %p536_p5 }
  0x52   :  { %413 = vmatprep.subr.bf16.mxu0 %v567_v0 }
  0x53   :  { %p539_p8 = pnand %p538_p7, %p532_p4 }
  0x55   :  { %414 = vmatpush3.bf16.msra.mxu0 %v440_v15 }
 0x122   :  { %v142_v8 = vpop.f32.mrb[0].mxu0 }
 0x123   :  { %v143_v9 = vadd.f32 %v371_v7, %v142_v8  ;;  %v401_v10 = vpop.f32.mrb[1].mxu0 }
 0x124   :  { %v145_v11 = vpop.f32.mrb[2].mxu0 }
 0x125   :  { %v148_v12 = vmax.f32 %v143_v9, 0.0  ;;  %v402_v13 = vpop.f32.mrb[3].mxu0 }
 0x127   :  { %v149_v14 = vpack.c.bf16 %v148_v12, %v148_v12 }
 0x129   :  { %408 = vmatmul.mubr.msk.bf16.vlgmr.msra.gmra.mrb[0].mxu1 %vm173_vm2, %v149_v14 }
 0x12a   :  { %423 = vmatprep.mubr.msk.bf16.mxu1 %vm568_vm0, %v567_v0  ;;  %420 = vmatpush3.bf16.msra.mxu1 %v441_v16 }
 0x12b   :  { %421 = vmatprep.subr.bf16.mxu1 %v567_v0 }
 0x12e   :  { %422 = vmatpush3.bf16.msra.mxu1 %v442_v25 }
 0x1fc   :  { %v211_v18 = vpop.f32.mrb[0].mxu1 }
 0x1fd   :  { %v212_v19 = vadd.f32 %v374_v17, %v211_v18  ;;  %v409_v20 = vpop.f32.mrb[1].mxu1 }
 0x1fe   :  { %v214_v21 = vpop.f32.mrb[2].mxu1 }
 0x1ff   :  { %v217_v22 = vmax.f32 %v212_v19, 0.0  ;;  %v410_v23 = vpop.f32.mrb[3].mxu1 }
 0x201   :  { %v218_v24 = vpack.c.bf16 %v217_v22, %v217_v22 }
 0x203   :  { %416 = vmatmul.mubr.msk.bf16.vlgmr.msra.gmra.mrb[4].mxu0 %vm173_vm2, %v218_v24 }
 0x2d6   :  { %v279_v27 = vpop.f32.mrb[4].mxu0 }
 0x2d7   :  { %v280_v28 = vadd.f32 %v378_v26, %v279_v27  ;;  %v417_v29 = vpop.f32.mrb[5].mxu0 }
 0x2d8   :  { %v282_v30 = vpop.f32.mrb[6].mxu0 }
 0x2d9   :  { %v285_v31 = vmax.f32 %v280_v28, 0.0  ;;  %v418_v32 = vpop.f32.mrb[7].mxu0 }
 0x2db   :  { %v286_v33 = vpack.c.bf16 %v285_v31, %v285_v31 }
 0x2dd   :  { %424 = vmatmul.mubr.msk.bf16.vlgmr.msra.gmra.mrb[4].mxu1 %vm173_vm2, %v286_v33 }
 0x3b0   :  { %v347_v35 = vpop.f32.mrb[4].mxu1 }
 0x3b1   :  { %v348_v36 = vadd.f32 %v382_v34, %v347_v35  ;;  %v425_v37 = vpop.f32.mrb[5].mxu1 }
 0x3b2   :  { %v350_v38 = vpop.f32.mrb[6].mxu1 }
 0x3b3   :  { %353 = vst [vmem:[#allocation10] sm:$0xff] %v348_v36  ;;  %v426_v39 = vpop.f32.mrb[7].mxu1 }
 0x3b4   :  { %542 = shalt.err (!%p539_p8)
}
 0x3b5   :  { %s543_s8 = scalar_lea.hbm %s723_s9, 128 }
 0x3b6   :  { %p544_p9 = scmp.ne.s32.totalorder %s723_s9, %s543_s8  ;;  %p547_p10 = scmp.lt.u32.totalorder %s543_s8, %s723_s9 }
 0x3b8   :  { %p549_p11 = pnand %p547_p10, %p544_p9 }
 0x3ba   :  { %552 = shalt.err (!%p549_p11)
}
 0x3bb   :  { %363 = dma.vmem_to_hbm [thread:$0]  %s361_s25, 128, %s723_s9, [#allocation4]  }
 0x3bc   :  { %559 = dma.done.wait [#allocation4], 128  }
 0x3bd   :  { %560 = vsyncadd [#allocation4], 4294967168 }
 0x3be   :  { %367 = vsyncpa [#allocation3], 1 }
 0x3bf   :  { %368 = vsyncpa [#allocation6], 1 }
 0x3c0   :  { %369 = vsyncpa [#allocation9], 1 }
 0x3c1   :  { %370 = vsyncpa [#allocation4], 1 }

</bundles_post_ra>
